<compile_context>
chip_gen: v6e
topology: v6e:2x2x1
jax: 0.10.0
libtpu: 0.0.40
codegen_flags: <defaults>
</compile_context>

<pallas_src>
import functools

import jax
import jax.numpy as jnp
from jax.experimental import pallas as pl
from jax.experimental.pallas import tpu as pltpu


def _round_up(x, m):
    return ((x + m - 1) // m) * m


def _critic_kernel(n_layers, reduce_last, *refs):
    """refs = (x_ref, w1_ref, b1_ref, ..., wn_ref, bn_ref, out_ref).

    Fully fused MLP for one batch tile: hidden matmuls on the MXU with f32
    accumulation, bias add / ReLU on the VPU, final projection as a lane
    reduction.
    """
    x_ref = refs[0]
    out_ref = refs[-1]
    h = x_ref[...]                                # storage dtype (f32 or bf16)
    for i in range(n_layers):
        w = refs[1 + 2 * i][...]
        b = refs[2 + 2 * i][...]                  # (1, out_features) -> broadcasts over rows
        last = i == n_layers - 1
        if last and reduce_last:
            # Output width is 1: w is stored pre-transposed as (1, h_last).
            # VPU multiply + cross-lane reduce instead of a 1-lane MXU matmul.
            acc = jnp.sum(h.astype(jnp.float32) * w.astype(jnp.float32),
                          axis=-1, keepdims=True) + b
        else:
            acc = jnp.dot(h.astype(w.dtype), w,
                          preferred_element_type=jnp.float32) + b
        if not last:
            acc = jnp.maximum(acc, 0.0)           # ReLU on hidden layers only
        h = acc                                   # f32; recast to weight dtype at next dot
    out_ref[...] = h.astype(out_ref.dtype)


def critic_forward(obs, params, *, batch_tile=1024, compute_dtype=jnp.float32,
                   lane_pad=128):
    """obs: (B, obs_dim) float32.  params: list of (W_(in,out), b_(out,)) tuples.

    Returns value estimates of shape (B,)  (matches v.squeeze(dim=-1)).

    batch_tile: rows per grid step (512-2048 is the mem-bound sweet spot; it is
      clipped for tiny batches).  compute_dtype: jnp.float32 or jnp.bfloat16 for
      the obs / hidden-weight HBM storage (MXU accumulation is always f32).
    """
    obs = jnp.asarray(obs)
    B, obs_dim = obs.shape
    n_layers = len(params)
    reduce_last = params[-1][0].shape[1] == 1

    # ---- Pad hidden feature widths up to the 128-lane width (exact; see header).
    sizes = [obs_dim] + [w.shape[1] for w, _ in params]
    padded = [obs_dim]
    for s in sizes[1:-1]:
        padded.append(_round_up(s, lane_pad))
    padded.append(sizes[-1])                      # final output width stays 1

    padded_params = []
    for i, (w, b) in enumerate(params):
        in_p, out_p = padded[i], padded[i + 1]
        last = i == n_layers - 1
        if last and reduce_last:
            # Store the output weight pre-transposed as (1, in_p), keep f32 (tiny).
            w_p = jnp.zeros((1, in_p), jnp.float32).at[0, : w.shape[0]].set(w[:, 0])
        else:
            w_p = jnp.zeros((in_p, out_p), jnp.float32)
            w_p = w_p.at[: w.shape[0], : w.shape[1]].set(w).astype(compute_dtype)
        b_p = jnp.zeros((1, out_p), jnp.float32).at[0, : b.shape[0]].set(b)
        padded_params.append((w_p, b_p))

    # ---- Batch tiling: pad B to a multiple of the tile so every block is full.
    tb = _round_up(min(batch_tile, _round_up(B, 8)), 8)
    padded_b = _round_up(B, tb)
    if padded_b != B:
        obs = jnp.pad(obs, ((0, padded_b - B), (0, 0)))
    obs = obs.astype(compute_dtype)
    num_tiles = padded_b // tb

    # ---- Flatten args and build specs.
    flat_args = [obs]
    in_specs = [pl.BlockSpec((tb, obs_dim), lambda i: (i, 0))]
    for w_p, b_p in padded_params:
        flat_args += [w_p, b_p]
        in_specs += [
            pl.BlockSpec(w_p.shape, lambda i: (0, 0)),   # resident across grid steps
            pl.BlockSpec(b_p.shape, lambda i: (0, 0)),
        ]
    out_spec = pl.BlockSpec((tb, 1), lambda i: (i, 0))

    out = pl.pallas_call(
        functools.partial(_critic_kernel, n_layers, reduce_last),
        out_shape=jax.ShapeDtypeStruct((padded_b, 1), jnp.float32),
        grid=(num_tiles,),
        in_specs=in_specs,
        out_specs=out_spec,
        compiler_params=pltpu.CompilerParams(
            dimension_semantics=("parallel",),           # megacore shard on v7x
        ),
    )(*flat_args)

    return out[:B, 0]  # drop batch padding + squeeze(dim=-1)


def init_critic_params(key, obs_dim, hidden_sizes):
    """Deterministic init mimicking nn.Linear default (U[-1/sqrt(fan_in), +...])."""
    sizes = [obs_dim] + list(hidden_sizes) + [1]
    params = []
    for j in range(len(sizes) - 1):
        fan_in, fan_out = sizes[j], sizes[j + 1]
        key, kw, kb = jax.random.split(key, 3)
        bound = 1.0 / jnp.sqrt(jnp.asarray(fan_in, jnp.float32))
        # Stored as (in, out); PyTorch stores (out, in) — this is W_pt.T.
        w = jax.random.uniform(kw, (fan_in, fan_out), jnp.float32, -bound, bound)
        b = jax.random.uniform(kb, (fan_out,), jnp.float32, -bound, bound)
        params.append((w, b))
    return params


def critic_forward_ref(obs, params):
    """Pure-JAX reference for correctness checking."""
    h = obs
    for i, (w, b) in enumerate(params):
        h = h @ w + b
        if i < len(params) - 1:
            h = jnp.maximum(h, 0.0)
    return h[:, 0]


if __name__ == "__main__":
    key = jax.random.PRNGKey(0)
    k_obs, k_params, k_obs2 = jax.random.split(key, 3)

    obs_dim = 16
    hidden_sizes = (32, 32)
    params = init_critic_params(k_params, obs_dim, hidden_sizes)

    # Small batch (single tile).
    obs = jax.random.normal(k_obs, (8, obs_dim), dtype=jnp.float32)
    v = jax.block_until_ready(critic_forward(obs, params))
    v_ref = critic_forward_ref(obs, params)
    assert v.shape == (8,), v.shape
    assert jnp.allclose(v, v_ref, atol=1e-5, rtol=1e-5), (v, v_ref)

    # Larger, non-divisible batch exercising the pipelined batch grid (4 tiles of 32).
    obs2 = jax.random.normal(k_obs2, (100, obs_dim), dtype=jnp.float32)
    v2 = jax.block_until_ready(critic_forward(obs2, params, batch_tile=32))
    v2_ref = critic_forward_ref(obs2, params)
    assert v2.shape == (100,), v2.shape
    assert jnp.allclose(v2, v2_ref, atol=1e-5, rtol=1e-5), (v2, v2_ref)

    # bf16 storage path (halves HBM read traffic of the dominant obs stream;
    # MXU still accumulates in f32).
    v3 = jax.block_until_ready(
        critic_forward(obs2, params, batch_tile=32, compute_dtype=jnp.bfloat16))
    assert v3.shape == (100,), v3.shape
    assert jnp.allclose(v3, v2_ref, atol=5e-2, rtol=5e-2), (v3, v2_ref)

    print("KERNEL_OK")
</pallas_src>

<mosaic_0001>
module attributes {stable_mosaic.version = 11 : i64} {
  func.func @_critic_kernel(%arg0: i32, %arg1: memref<8x16xf32, #tpu.memory_space<vmem>>, %arg2: memref<16x128xf32, #tpu.memory_space<vmem>>, %arg3: memref<1x128xf32, #tpu.memory_space<vmem>>, %arg4: memref<128x128xf32, #tpu.memory_space<vmem>>, %arg5: memref<1x128xf32, #tpu.memory_space<vmem>>, %arg6: memref<1x128xf32, #tpu.memory_space<vmem>>, %arg7: memref<1x1xf32, #tpu.memory_space<vmem>>, %arg8: memref<8x1xf32, #tpu.memory_space<vmem>>) attributes {dimension_semantics = [#tpu.dimension_semantics<parallel>], iteration_bounds = array<i64: 1>, scalar_prefetch = 0 : i64, scratch_operands = 0 : i64, tpu.core_type = #tpu.core_type<tc>, window_params = [{transform_indices = @transform_0, window_bounds = array<i64: 8, 16>}, {pipeline_mode = #tpu.pipeline_mode<synchronous>, transform_indices = @transform_1, window_bounds = array<i64: 16, 128>}, {pipeline_mode = #tpu.pipeline_mode<synchronous>, transform_indices = @transform_2, window_bounds = array<i64: 1, 128>}, {pipeline_mode = #tpu.pipeline_mode<synchronous>, transform_indices = @transform_3, window_bounds = array<i64: 128, 128>}, {pipeline_mode = #tpu.pipeline_mode<synchronous>, transform_indices = @transform_4, window_bounds = array<i64: 1, 128>}, {pipeline_mode = #tpu.pipeline_mode<synchronous>, transform_indices = @transform_5, window_bounds = array<i64: 1, 128>}, {pipeline_mode = #tpu.pipeline_mode<synchronous>, transform_indices = @transform_6, window_bounds = array<i64: 1, 1>}, {transform_indices = @transform_7, window_bounds = array<i64: 8, 1>}]} {
    %c0 = arith.constant 0 : index
    %c0_0 = arith.constant 0 : index
    %0 = vector.load %arg1[%c0, %c0_0] : memref<8x16xf32, #tpu.memory_space<vmem>>, vector<8x16xf32>
    %c0_1 = arith.constant 0 : index
    %c0_2 = arith.constant 0 : index
    %1 = vector.load %arg2[%c0_1, %c0_2] : memref<16x128xf32, #tpu.memory_space<vmem>>, vector<16x128xf32>
    %c0_3 = arith.constant 0 : index
    %c0_4 = arith.constant 0 : index
    %2 = vector.load %arg3[%c0_3, %c0_4] : memref<1x128xf32, #tpu.memory_space<vmem>>, vector<1x128xf32>
    %cst = arith.constant dense<0.000000e+00> : vector<8x128xf32>
    %3 = tpu.matmul %0, %1, %cst {dimension_numbers = #tpu.dot_dimension_numbers<[1], [0], [0], [1], [0, 0, 1, 1], [], []>} : vector<8x16xf32>, vector<16x128xf32>, vector<8x128xf32> -> vector<8x128xf32>
    %4 = vector.broadcast %2 : vector<1x128xf32> to vector<8x128xf32>
    %5 = arith.addf %3, %4 : vector<8x128xf32>
    %cst_5 = arith.constant 0.000000e+00 : f32
    %6 = vector.broadcast %cst_5 : f32 to vector<8x128xf32>
    %7 = arith.maximumf %5, %6 : vector<8x128xf32>
    %c0_6 = arith.constant 0 : index
    %c0_7 = arith.constant 0 : index
    %8 = vector.load %arg4[%c0_6, %c0_7] : memref<128x128xf32, #tpu.memory_space<vmem>>, vector<128x128xf32>
    %c0_8 = arith.constant 0 : index
    %c0_9 = arith.constant 0 : index
    %9 = vector.load %arg5[%c0_8, %c0_9] : memref<1x128xf32, #tpu.memory_space<vmem>>, vector<1x128xf32>
    %cst_10 = arith.constant dense<0.000000e+00> : vector<8x128xf32>
    %10 = tpu.matmul %7, %8, %cst_10 {dimension_numbers = #tpu.dot_dimension_numbers<[1], [0], [0], [1], [0, 0, 1, 1], [], []>} : vector<8x128xf32>, vector<128x128xf32>, vector<8x128xf32> -> vector<8x128xf32>
    %11 = vector.broadcast %9 : vector<1x128xf32> to vector<8x128xf32>
    %12 = arith.addf %10, %11 : vector<8x128xf32>
    %cst_11 = arith.constant 0.000000e+00 : f32
    %13 = vector.broadcast %cst_11 : f32 to vector<8x128xf32>
    %14 = arith.maximumf %12, %13 : vector<8x128xf32>
    %c0_12 = arith.constant 0 : index
    %c0_13 = arith.constant 0 : index
    %15 = vector.load %arg6[%c0_12, %c0_13] : memref<1x128xf32, #tpu.memory_space<vmem>>, vector<1x128xf32>
    %c0_14 = arith.constant 0 : index
    %c0_15 = arith.constant 0 : index
    %16 = vector.load %arg7[%c0_14, %c0_15] : memref<1x1xf32, #tpu.memory_space<vmem>>, vector<1x1xf32>
    %17 = vector.broadcast %15 : vector<1x128xf32> to vector<8x128xf32>
    %18 = arith.mulf %14, %17 : vector<8x128xf32>
    %cst_16 = arith.constant dense<0.000000e+00> : vector<8xf32>
    %19 = vector.multi_reduction <add>, %18, %cst_16 [1] : vector<8x128xf32> to vector<8xf32>
    %20 = vector.shape_cast %19 : vector<8xf32> to vector<8x1xf32>
    %21 = vector.broadcast %16 : vector<1x1xf32> to vector<8x1xf32>
    %22 = arith.addf %20, %21 : vector<8x1xf32>
    %c0_17 = arith.constant 0 : index
    %c0_18 = arith.constant 0 : index
    %23 = vector.load %arg8[%c0_17, %c0_18] : memref<8x1xf32, #tpu.memory_space<vmem>>, vector<8x1xf32>
    tpu.vector_store %arg8[%c0_17, %c0_18], %22 {strides = array<i32>} : memref<8x1xf32, #tpu.memory_space<vmem>>, vector<8x1xf32>,
    return
  }
  func.func @transform_0(%arg0: i32) -> (i32, i32) {
    %c0_i32 = arith.constant 0 : i32
    %c0_i32_0 = arith.constant 0 : i32
    return %arg0, %c0_i32 : i32, i32
  }
  func.func @transform_1(%arg0: i32) -> (i32, i32) {
    %c0_i32 = arith.constant 0 : i32
    %c0_i32_0 = arith.constant 0 : i32
    %c0_i32_1 = arith.constant 0 : i32
    return %c0_i32, %c0_i32_0 : i32, i32
  }
  func.func @transform_2(%arg0: i32) -> (i32, i32) {
    %c0_i32 = arith.constant 0 : i32
    %c0_i32_0 = arith.constant 0 : i32
    %c0_i32_1 = arith.constant 0 : i32
    return %c0_i32, %c0_i32_0 : i32, i32
  }
  func.func @transform_3(%arg0: i32) -> (i32, i32) {
    %c0_i32 = arith.constant 0 : i32
    %c0_i32_0 = arith.constant 0 : i32
    %c0_i32_1 = arith.constant 0 : i32
    return %c0_i32, %c0_i32_0 : i32, i32
  }
  func.func @transform_4(%arg0: i32) -> (i32, i32) {
    %c0_i32 = arith.constant 0 : i32
    %c0_i32_0 = arith.constant 0 : i32
    %c0_i32_1 = arith.constant 0 : i32
    return %c0_i32, %c0_i32_0 : i32, i32
  }
  func.func @transform_5(%arg0: i32) -> (i32, i32) {
    %c0_i32 = arith.constant 0 : i32
    %c0_i32_0 = arith.constant 0 : i32
    %c0_i32_1 = arith.constant 0 : i32
    return %c0_i32, %c0_i32_0 : i32, i32
  }
  func.func @transform_6(%arg0: i32) -> (i32, i32) {
    %c0_i32 = arith.constant 0 : i32
    %c0_i32_0 = arith.constant 0 : i32
    %c0_i32_1 = arith.constant 0 : i32
    return %c0_i32, %c0_i32_0 : i32, i32
  }
  func.func @transform_7(%arg0: i32) -> (i32, i32) {
    %c0_i32 = arith.constant 0 : i32
    %c0_i32_0 = arith.constant 0 : i32
    return %arg0, %c0_i32 : i32, i32
  }
}

</mosaic_0001>

<bundles_post_ra>
// kernel: tpu_custom_call.1
= control target key start
LH: loop header
LB: loop body
LE: loop exit
PB: predicated region body
PF: predicated region fallthrough
CT: control target
= control target key end

     0   :  { %s481_s0 = inlined_call_operand.hbm [shape: f32[8,16], index: 0, kind: input, shape index: {}]   ;;  %s482_s1 = inlined_call_operand.hbm [shape: f32[16,128], index: 1, kind: input, shape index: {}]   ;;  %s483_s2 = inlined_call_operand.vmem [shape: f32[1,128], index: 2, kind: input, shape index: {}]   ;;  %s484_s3 = inlined_call_operand.hbm [shape: f32[128,128], index: 3, kind: input, shape index: {}]   ;;  %s485_s4 = inlined_call_operand.vmem [shape: f32[1,128], index: 4, kind: input, shape index: {}]   ;;  %s486_s5 = inlined_call_operand.vmem [shape: f32[1,128], index: 5, kind: input, shape index: {}]   ;;  %s487_s6 = inlined_call_operand.<no memory space> [shape: f32[1,1], index: 6, kind: input, shape index: {}]   ;;  %s488_s7 = inlined_call_operand.vmem [shape: f32[8,1], index: 7, kind: output, shape index: {}]  }
   0x1   :  { %v12_v0 = vstv %s487_s6 }
   0x2   :  { %13 = vst [vmem:[#allocation2] sm:$0x1] %v12_v0 }
   0x3   :  { %14 = vsyncpa [#allocation4], 0 }
   0x4   :  { %15 = vsyncpa [#allocation6], 0  ;;  %s410_s26 = smov [#allocation5]  }
   0x5   :  { %s31_s27 = sshll.u32 %s410_s26, 4  ;;  %s32_s27 = int_to_ptr.vmem [resolvable:$true] %s31_s27 }
   0x6   :  { %s354_s28 = scalar_lea.vmem %s32_s27, 256  ;;  %p359_p1 = scmp.lt.s32.totalorder %s32_s27, %s32_s27 }
   0x7   :  { %p355_p0 = scmp.ne.s32.totalorder %s32_s27, %s354_s28  ;;  %p360_p2 = scmp.lt.s32.totalorder %s354_s28, %s354_s28 }
   0x9   :  { %p361_p3 = por %p360_p2, %p359_p1 }
   0xb   :  { %p362_p4 = pnand %p361_p3, %p355_p0 }
   0xd   :  { %365 = shalt.err (!%p362_p4)
}
   0xe   :  { %s411_s29 = smov 128   ;;  %s412_s30 = smov 8  }
   0xf   :  { %37 = dma.hbm_to_vmem [thread:$0]  %s482_s1, 256, %s32_s27, [#allocation6], %s411_s29, %s411_s29, %s412_s30  }
  0x10   :  { %s413_s6 = smov [#allocation3]   ;;  %s414_s11 = smov [#allocation7]  }
  0x11   :  { %s22_s10 = sshll.u32 %s413_s6, 4  ;;  %s45_s12 = sshll.u32 %s414_s11, 4  ;;  %s23_s10 = int_to_ptr.vmem [resolvable:$true] %s22_s10  ;;  %s46_s12 = int_to_ptr.vmem [resolvable:$true] %s45_s12 }
  0x12   :  { %s374_s13 = scalar_lea.vmem %s23_s10, 128  ;;  %p379_p6 = scmp.lt.s32.totalorder %s23_s10, %s23_s10 }
  0x13   :  { %p375_p5 = scmp.ne.s32.totalorder %s23_s10, %s374_s13  ;;  %p380_p7 = scmp.lt.s32.totalorder %s374_s13, %s374_s13 }
  0x15   :  { %p381_p8 = por %p380_p7, %p379_p6 }
  0x17   :  { %p382_p9 = pnand %p381_p8, %p375_p5 }
  0x19   :  { %385 = shalt.err (!%p382_p9)
}
  0x1a   :  { %25 = dma.hbm_to_vmem [thread:$0]  %s481_s0, 128, %s23_s10, [#allocation4]  }
  0x1b   :  { %s394_s16 = scalar_lea.vmem %s46_s12, 2048  ;;  %p399_p11 = scmp.lt.s32.totalorder %s46_s12, %s46_s12 }
  0x1c   :  { %p395_p10 = scmp.ne.s32.totalorder %s46_s12, %s394_s16  ;;  %p400_p12 = scmp.lt.s32.totalorder %s394_s16, %s394_s16 }
  0x1e   :  { %p401_p13 = por %p400_p12, %p399_p11 }
  0x20   :  { %p402_p0 = pnand %p401_p13, %p395_p10 }
  0x22   :  { %405 = shalt.err (!%p402_p0)
}
  0x23   :  { %51 = dma.hbm_to_vmem [thread:$0]  %s484_s3, 2048, %s46_s12, [#allocation6], %s411_s29, %s411_s29, %s412_s30  }
  0x24   :  { %406 = dma.done.wait [#allocation4], 128  }
  0x25   :  { %407 = vsyncadd [#allocation4], 4294967168 }
  0x26   :  { %408 = dma.done.wait [#allocation6], 2304  }
  0x27   :  { %409 = vsyncadd [#allocation6], 4294964992  ;;  %v415_v1 = vmov 0.0   ;;  %vm416_vm0 = vmmov 0   ;;  %v69_v2 = vld [vmem:[#allocation5 + $0x8] sm:$0xff]  ;;  %v68_v3 = vld [vmem:[#allocation5] sm:$0xff] }
  0x28   :  { %297 = vmatprep.subr.mxu0 %v415_v1  ;;  %301 = vmatprep.mubr.msk.f32.mxu0 %vm416_vm0, %v415_v1  ;;  %v67_v4 = vld [vmem:[#allocation3] sm:$0xff]  ;;  %vm77_vm1 = vcmask 130048   ;;  %v167_v5 = vld [vmem:[#allocation7 + $0x78] sm:$0xff]  ;;  %v166_v6 = vld [vmem:[#allocation7 + $0x70] sm:$0xff]  ;;  %vm264_vm2 = vcmask 7168  }
  0x29   :  { %304 = vmatprep.subr.mxu1 %v415_v1  ;;  %336 = vmatprep.mubr.msk.f32.mxu1 %vm416_vm0, %v415_v1  ;;  %v165_v7 = vld [vmem:[#allocation7 + $0x68] sm:$0xff]  ;;  %v164_v8 = vld [vmem:[#allocation7 + $0x60] sm:$0xff]  ;;  %v163_v9 = vld [vmem:[#allocation7 + $0x58] sm:$0xff] }
  0x2a   :  { %298 = vmatpush3.msra.mxu0 %v69_v2  ;;  %305 = vmatpush3.msra.mxu1 %v167_v5  ;;  %v162_v10 = vld [vmem:[#allocation7 + $0x50] sm:$0xff]  ;;  %v161_v11 = vld [vmem:[#allocation7 + $0x48] sm:$0xff]  ;;  %v160_v12 = vld [vmem:[#allocation7 + $0x40] sm:$0xff] }
  0x2b   :  { %299 = vmatprep.subr.mxu0 %v415_v1  ;;  %306 = vmatprep.subr.mxu1 %v415_v1  ;;  %v159_v13 = vld [vmem:[#allocation7 + $0x38] sm:$0xff]  ;;  %v158_v14 = vld [vmem:[#allocation7 + $0x30] sm:$0xff]  ;;  %v157_v15 = vld [vmem:[#allocation7 + $0x28] sm:$0xff] }
  0x2c   :  { %300 = vmatpush3.msra.mxu0 %v68_v3  ;;  %307 = vmatpush3.msra.mxu1 %v166_v6  ;;  %v156_v16 = vld [vmem:[#allocation7 + $0x20] sm:$0xff]  ;;  %v155_v17 = vld [vmem:[#allocation7 + $0x18] sm:$0xff]  ;;  %v154_v18 = vld [vmem:[#allocation7 + $0x10] sm:$0xff] }
  0x2d   :  { %302 = vmatmul.mubr.msk.f32.vlgmr.msra.gmra.mxu0 %vm77_vm1, %v67_v4  ;;  %308 = vmatprep.subr.mxu1 %v415_v1  ;;  %v153_v19 = vld [vmem:[#allocation7 + $0x8] sm:$0xff]  ;;  %v152_v20 = vld [vmem:[#allocation7] sm:$0xff] }
  0x2e   :  { %309 = vmatpush3.msra.mxu1 %v165_v7  ;;  %v272_v21 = vld [vmem:[%s483_s2] ss:$0 sm:$0xff] }
  0x2f   :  { %310 = vmatprep.subr.mxu1 %v415_v1  ;;  %v274_v26 = vld [vmem:[%s485_s4] ss:$0 sm:$0xff] }
  0x30   :  { %311 = vmatpush3.msra.mxu1 %v164_v8  ;;  %v275_v30 = vld [vmem:[%s486_s5] ss:$0 sm:$0xff] }
  0x31   :  { %312 = vmatprep.subr.mxu1 %v415_v1  ;;  %v276_v33 = vld [vmem:[#allocation2] ss:$0 sm:$0xff] }
  0x32   :  { %313 = vmatpush3.msra.mxu1 %v163_v9 }
  0x33   :  { %314 = vmatprep.subr.mxu1 %v415_v1 }
  0x34   :  { %315 = vmatpush3.msra.mxu1 %v162_v10 }
  0x35   :  { %316 = vmatprep.subr.mxu1 %v415_v1 }
  0x36   :  { %317 = vmatpush3.msra.mxu1 %v161_v11 }
  0x37   :  { %318 = vmatprep.subr.mxu1 %v415_v1 }
  0x38   :  { %319 = vmatpush3.msra.mxu1 %v160_v12 }
  0x39   :  { %320 = vmatprep.subr.mxu1 %v415_v1 }
  0x3a   :  { %321 = vmatpush3.msra.mxu1 %v159_v13 }
  0x3b   :  { %322 = vmatprep.subr.mxu1 %v415_v1 }
  0x3c   :  { %323 = vmatpush3.msra.mxu1 %v158_v14 }
  0x3d   :  { %324 = vmatprep.subr.mxu1 %v415_v1 }
  0x3e   :  { %325 = vmatpush3.msra.mxu1 %v157_v15 }
  0x3f   :  { %326 = vmatprep.subr.mxu1 %v415_v1 }
  0x40   :  { %327 = vmatpush3.msra.mxu1 %v156_v16 }
  0x41   :  { %328 = vmatprep.subr.mxu1 %v415_v1 }
  0x42   :  { %329 = vmatpush3.msra.mxu1 %v155_v17 }
  0x43   :  { %330 = vmatprep.subr.mxu1 %v415_v1 }
  0x44   :  { %331 = vmatpush3.msra.mxu1 %v154_v18 }
  0x45   :  { %332 = vmatprep.subr.mxu1 %v415_v1 }
  0x46   :  { %333 = vmatpush3.msra.mxu1 %v153_v19 }
  0x47   :  { %334 = vmatprep.subr.mxu1 %v415_v1 }
  0x48   :  { %335 = vmatpush3.msra.mxu1 %v152_v20 }
  0xed   :  { %v147_v22 = vpop.f32.mrf.mxu0 }
  0xee   :  { %v148_v23 = vadd.f32 %v272_v21, %v147_v22 }
  0xef   :  { %v303_v24 = vpop.f32.mrf.mxu0 }
  0xf0   :  { %v151_v25 = vmax.f32 %v148_v23, 0.0 }
  0xf2   :  { %337 = vmatmul.mubr.f32.vlgmr.msra.gmra.mxu1 %v151_v25 }
 0x1b2   :  { %v241_v27 = vpop.f32.mrf.mxu1 }
 0x1b3   :  { %v242_v28 = vadd.f32 %v274_v26, %v241_v27 }
 0x1b4   :  { %v338_v29 = vpop.f32.mrf.mxu1 }
 0x1b5   :  { %v245_v31 = vmax.f32 %v242_v28, 0.0 }
 0x1b7   :  { %v254_v32 = vmul.f32 %v275_v30, %v245_v31 }
 0x1b9   :  { %255 = vadd.xlane.f32.xlu0 %v254_v32 }
 0x242   :  { %v256_v34 = vpop.xlane.xlu0 %255 }
 0x243   :  { %v263_v35 = vadd.f32 %v276_v33, %v256_v34 }
 0x245   :  { %265 = vst.msk [vmem:[%s488_s7] sm:$0xff] %vm264_vm2, %v263_v35 }
 0x246   :  { %270 = vsyncpa [#allocation4], 1 }
 0x247   :  { %271 = vsyncpa [#allocation6], 1 }

</bundles_post_ra>
